<compile_context>
chip_gen: v5e
topology: v5e:2x2
jax: 0.10.0
libtpu: 0.0.40
codegen_flags: <defaults>
</compile_context>

<pallas_src>
import math

import jax
import jax.numpy as jnp
from jax.experimental import pallas as pl
from jax.experimental.pallas import tpu as pltpu

EMBED_DIM = 8
HIDDEN = (64, 32, 16)
BN_EPS = 1e-5
LEAKY_SLOPE = 0.2
DEFAULT_TILE_B = 8192

# Per-lane-column VMEM estimate (f32 bytes): double-buffered (16,TB) input,
# double-buffered (1,TB) output, MLP intermediates (64+32+16), plus slack.
_BYTES_PER_COL = (2 * (2 * EMBED_DIM) + 2 * 1 + sum(HIDDEN) + 32) * 4


def _round_up(x, m):
    return ((x + m - 1) // m) * m


def _vmem_capacity_bytes():
    try:
        return int(pltpu.get_tpu_info().vmem_capacity_bytes)
    except Exception:
        return 64 << 20  # conservative fallback (v7x per-TensorCore VMEM)


def _pick_tile(B, tile_b):
    """Lane-dense batch tile: multiple of 128, generation-aware VMEM cap."""
    vmem = _vmem_capacity_bytes()
    cap = (vmem // 4) // _BYTES_PER_COL          # use at most ~1/4 of VMEM per tile
    cap = max(128, (cap // 128) * 128)
    tb = min(tile_b, cap, _round_up(B, 128))
    tb = max(128, _round_up(tb, 128))
    assert tb % 128 == 0
    return tb


def ncf_kernel(act_ref,
               w1_ref, b1_ref,
               w2_ref, b2_ref,
               w3_ref, b3_ref,
               gmf_ref, mlp_ref, bias_ref,
               o_ref):
    act = act_ref[...]                                   # (16, TB): rows 0..7 = u, 8..15 = v

    def leaky(x):
        return jnp.where(x > 0, x, LEAKY_SLOPE * x)

    # ---- MLP branch (BN folded into the Linears; Dropout is identity in eval) ----
    h = jnp.dot(w1_ref[...], act, preferred_element_type=jnp.float32) + b1_ref[...]   # (64, TB)
    h = leaky(h)
    h = jnp.dot(w2_ref[...], h, preferred_element_type=jnp.float32) + b2_ref[...]     # (32, TB)
    h = leaky(h)
    h = jnp.dot(w3_ref[...], h, preferred_element_type=jnp.float32) + b3_ref[...]     # (16, TB)
    h = leaky(h)

    # ---- heads (final Linear(2,1) pre-folded into gmf/mlp columns + fused bias) ----
    u = act[:EMBED_DIM, :]                               # (8, TB) sublane slice
    v = act[EMBED_DIM:, :]                               # (8, TB)
    gmf = jnp.sum((u * v) * gmf_ref[...], axis=0, keepdims=True)   # (1, TB)
    mlp = jnp.sum(h * mlp_ref[...], axis=0, keepdims=True)         # (1, TB)

    o_ref[...] = gmf + mlp + bias_ref[...]               # lane-dense (1, TB) unmasked store


def init_params(key, num_users, num_items,
                embed_dim=EMBED_DIM, hidden_dims=HIDDEN):
    keys = jax.random.split(key, 16)
    ki = iter(range(16))

    def xavier(k, shape):
        fan_in, fan_out = shape
        bound = (6.0 / (fan_in + fan_out)) ** 0.5
        return jax.random.uniform(k, shape, jnp.float32, -bound, bound)

    def linear(k, fan_in, fan_out):
        # torch nn.Linear default init: U(-1/sqrt(fan_in), 1/sqrt(fan_in)); stored (in, out)
        kw, kb = jax.random.split(k)
        bound = 1.0 / (fan_in ** 0.5)
        w = jax.random.uniform(kw, (fan_in, fan_out), jnp.float32, -bound, bound)
        b = jax.random.uniform(kb, (1, fan_out), jnp.float32, -bound, bound)
        return w, b

    p = {}
    p["user_embed"] = xavier(keys[next(ki)], (num_users, embed_dim))
    p["item_embed"] = xavier(keys[next(ki)], (num_items, embed_dim))
    p["gmf_w"], p["gmf_b"] = linear(keys[next(ki)], embed_dim, 1)

    in_dim = 2 * embed_dim
    for li, h in enumerate(hidden_dims, start=1):
        w, b = linear(keys[next(ki)], in_dim, h)
        p[f"w{li}"], p[f"b{li}"] = w, b
        p[f"g{li}"] = jnp.ones((1, h), jnp.float32)    # BN gamma
        p[f"be{li}"] = jnp.zeros((1, h), jnp.float32)  # BN beta
        p[f"rm{li}"] = jnp.zeros((1, h), jnp.float32)  # BN running_mean
        p[f"rv{li}"] = jnp.ones((1, h), jnp.float32)   # BN running_var
        in_dim = h

    p["wmo"], p["bmo"] = linear(keys[next(ki)], hidden_dims[-1], 1)

    wfin, bfin = linear(keys[next(ki)], 2, 1)
    p["wfin"] = wfin.reshape(2)
    p["bfin"] = bfin.reshape(1)
    return p


def fold_params(p, hidden_dims=HIDDEN):
    """Host-side folding: BN(eval) into Linears, final Linear(2,1) into the heads.
    Tables stored pre-transposed so the gather lands directly in (feature, batch)."""
    fp = {"user_embed_t": p["user_embed"].T,     # (8, num_users)
          "item_embed_t": p["item_embed"].T}     # (8, num_items)

    ws, bs = [], []
    for li in range(1, len(hidden_dims) + 1):
        scale = p[f"g{li}"] * jax.lax.rsqrt(p[f"rv{li}"] + BN_EPS)     # (1, H)
        w = p[f"w{li}"] * scale                                        # (in, H)
        b = (p[f"b{li}"] - p[f"rm{li}"]) * scale + p[f"be{li}"]        # (1, H)
        ws.append(w.T)                                                 # (H, in)
        bs.append(b.T)                                                 # (H, 1)

    fp["w1"], fp["b1"] = ws[0], bs[0]            # (64, 16), (64, 1)
    fp["w2"], fp["b2"] = ws[1], bs[1]            # (32, 64), (32, 1)
    fp["w3"], fp["b3"] = ws[2], bs[2]            # (16, 32), (16, 1)

    wfin, bfin = p["wfin"], p["bfin"]            # (2,), (1,)
    fp["gmf_w"] = p["gmf_w"] * wfin[0]           # (8, 1)
    fp["mlp_w"] = p["wmo"] * wfin[1]             # (16, 1)
    fp["bias"] = (p["gmf_b"][0, 0] * wfin[0]
                  + p["bmo"][0, 0] * wfin[1]
                  + bfin[0]).reshape(1, 1)       # (1, 1)
    return fp


def ncf_forward(user_ids, item_ids, fp, tile_b=DEFAULT_TILE_B):
    # Gather from pre-transposed tables: activation lands directly in
    # (feature, batch) layout with batch on the lane axis (no transpose copy).
    u_t = jnp.take(fp["user_embed_t"], user_ids, axis=1)        # (8, B)
    v_t = jnp.take(fp["item_embed_t"], item_ids, axis=1)        # (8, B)
    B = user_ids.shape[0]

    TB = _pick_tile(B, tile_b)                                   # multiple of 128
    B_pad = _round_up(B, TB)
    act = jnp.concatenate([u_t, v_t], axis=0)                    # (16, B)
    act = jnp.pad(act, ((0, 0), (0, B_pad - B)))                 # (16, B_pad)

    weights = [fp["w1"], fp["b1"], fp["w2"], fp["b2"], fp["w3"], fp["b3"],
               fp["gmf_w"], fp["mlp_w"], fp["bias"]]

    def const_spec(a):  # whole tiny array, VMEM-resident across the batch grid
        return pl.BlockSpec(a.shape, lambda i: (0, 0))

    weight_bytes = sum(int(math.prod(w.shape)) * 4 for w in weights)
    work_bytes = _BYTES_PER_COL * TB + weight_bytes
    vmem_limit = int(min(_vmem_capacity_bytes(), max(32 << 20, 2 * work_bytes)))

    out = pl.pallas_call(
        ncf_kernel,
        out_shape=jax.ShapeDtypeStruct((1, B_pad), jnp.float32),
        grid=(B_pad // TB,),
        in_specs=[pl.BlockSpec((2 * EMBED_DIM, TB), lambda i: (0, i))]
                 + [const_spec(w) for w in weights],
        out_specs=pl.BlockSpec((1, TB), lambda i: (0, i)),
        compiler_params=pltpu.CompilerParams(
            dimension_semantics=("parallel",),
            vmem_limit_bytes=vmem_limit),
    )(act, *weights)

    # torch .squeeze() on (B, 1) -> (B,); padded tail columns are sliced off here.
    return out[0, :B]


# TODO(synk): training-mode BatchNorm (batch statistics) and Dropout sampling are not
# implemented (eval-mode semantics); embedding gather stays as XLA glue outside the
# kernel (in-kernel gather with VMEM-resident tables is a further option when tables fit).

if __name__ == "__main__":
    num_users, num_items, batch = 50, 40, 8
    key = jax.random.PRNGKey(0)
    kp, ku, kit = jax.random.split(key, 3)

    params = init_params(kp, num_users, num_items)
    folded = fold_params(params)

    user_ids = jax.random.randint(ku, (batch,), 0, num_users, dtype=jnp.int32)
    item_ids = jax.random.randint(kit, (batch,), 0, num_items, dtype=jnp.int32)

    fwd = jax.jit(ncf_forward)  # fuses gather -> concat -> pad with the pallas_call input
    out = fwd(user_ids, item_ids, folded)
    jax.block_until_ready(out)

    # Pure-JAX eval-mode reference (unfolded math) for a sanity check.
    def ref_forward(uids, iids, p):
        u = jnp.take(p["user_embed"], uids, axis=0)
        v = jnp.take(p["item_embed"], iids, axis=0)
        gmf_out = (u * v) @ p["gmf_w"] + p["gmf_b"]
        x = jnp.concatenate([u, v], axis=1)
        for li in range(1, len(HIDDEN) + 1):
            x = x @ p[f"w{li}"] + p[f"b{li}"]
            scale = p[f"g{li}"] * jax.lax.rsqrt(p[f"rv{li}"] + BN_EPS)
            x = (x - p[f"rm{li}"]) * scale + p[f"be{li}"]
            x = jnp.where(x > 0, x, LEAKY_SLOPE * x)
        mlp_out = x @ p["wmo"] + p["bmo"]
        comb = jnp.concatenate([gmf_out, mlp_out], axis=1)
        return (comb @ p["wfin"].reshape(2, 1) + p["bfin"]).squeeze()

    ref = ref_forward(user_ids, item_ids, params)
    assert out.shape == (batch,)
    assert jnp.allclose(out, ref, rtol=2e-2, atol=2e-2)
    print("KERNEL_OK")
</pallas_src>

<mosaic_0001>
module attributes {stable_mosaic.version = 11 : i64} {
  func.func @ncf_kernel(%arg0: i32, %arg1: memref<16x128xf32, #tpu.memory_space<vmem>>, %arg2: memref<64x16xf32, #tpu.memory_space<vmem>>, %arg3: memref<64x1xf32, #tpu.memory_space<vmem>>, %arg4: memref<32x64xf32, #tpu.memory_space<vmem>>, %arg5: memref<32x1xf32, #tpu.memory_space<vmem>>, %arg6: memref<16x32xf32, #tpu.memory_space<vmem>>, %arg7: memref<16x1xf32, #tpu.memory_space<vmem>>, %arg8: memref<8x1xf32, #tpu.memory_space<vmem>>, %arg9: memref<16x1xf32, #tpu.memory_space<vmem>>, %arg10: memref<1x1xf32, #tpu.memory_space<vmem>>, %arg11: memref<1x128xf32, #tpu.memory_space<vmem>>) attributes {dimension_semantics = [#tpu.dimension_semantics<parallel>], iteration_bounds = array<i64: 1>, scalar_prefetch = 0 : i64, scratch_operands = 0 : i64, tpu.core_type = #tpu.core_type<tc>, window_params = [{transform_indices = @transform_0, window_bounds = array<i64: 16, 128>}, {pipeline_mode = #tpu.pipeline_mode<synchronous>, transform_indices = @transform_1, window_bounds = array<i64: 64, 16>}, {pipeline_mode = #tpu.pipeline_mode<synchronous>, transform_indices = @transform_2, window_bounds = array<i64: 64, 1>}, {pipeline_mode = #tpu.pipeline_mode<synchronous>, transform_indices = @transform_3, window_bounds = array<i64: 32, 64>}, {pipeline_mode = #tpu.pipeline_mode<synchronous>, transform_indices = @transform_4, window_bounds = array<i64: 32, 1>}, {pipeline_mode = #tpu.pipeline_mode<synchronous>, transform_indices = @transform_5, window_bounds = array<i64: 16, 32>}, {pipeline_mode = #tpu.pipeline_mode<synchronous>, transform_indices = @transform_6, window_bounds = array<i64: 16, 1>}, {pipeline_mode = #tpu.pipeline_mode<synchronous>, transform_indices = @transform_7, window_bounds = array<i64: 8, 1>}, {pipeline_mode = #tpu.pipeline_mode<synchronous>, transform_indices = @transform_8, window_bounds = array<i64: 16, 1>}, {pipeline_mode = #tpu.pipeline_mode<synchronous>, transform_indices = @transform_9, window_bounds = array<i64: 1, 1>}, {transform_indices = @transform_10, window_bounds = array<i64: 1, 128>}]} {
    %c0 = arith.constant 0 : index
    %c0_0 = arith.constant 0 : index
    %0 = vector.load %arg1[%c0, %c0_0] : memref<16x128xf32, #tpu.memory_space<vmem>>, vector<16x128xf32>
    %c0_1 = arith.constant 0 : index
    %c0_2 = arith.constant 0 : index
    %1 = vector.load %arg2[%c0_1, %c0_2] : memref<64x16xf32, #tpu.memory_space<vmem>>, vector<64x16xf32>
    %cst = arith.constant dense<0.000000e+00> : vector<64x128xf32>
    %2 = tpu.matmul %1, %0, %cst {dimension_numbers = #tpu.dot_dimension_numbers<[1], [0], [0], [1], [0, 0, 1, 1], [], []>} : vector<64x16xf32>, vector<16x128xf32>, vector<64x128xf32> -> vector<64x128xf32>
    %c0_3 = arith.constant 0 : index
    %c0_4 = arith.constant 0 : index
    %3 = vector.load %arg3[%c0_3, %c0_4] : memref<64x1xf32, #tpu.memory_space<vmem>>, vector<64x1xf32>
    %4 = vector.broadcast %3 : vector<64x1xf32> to vector<64x128xf32>
    %5 = arith.addf %2, %4 : vector<64x128xf32>
    %cst_5 = arith.constant 0.000000e+00 : f32
    %6 = vector.broadcast %cst_5 : f32 to vector<64x128xf32>
    %7 = arith.cmpf ogt, %5, %6 : vector<64x128xf32>
    %cst_6 = arith.constant 2.000000e-01 : f32
    %8 = vector.broadcast %cst_6 : f32 to vector<64x128xf32>
    %9 = arith.mulf %8, %5 : vector<64x128xf32>
    %10 = arith.select %7, %5, %9 : vector<64x128xi1>, vector<64x128xf32>
    %c0_7 = arith.constant 0 : index
    %c0_8 = arith.constant 0 : index
    %11 = vector.load %arg4[%c0_7, %c0_8] : memref<32x64xf32, #tpu.memory_space<vmem>>, vector<32x64xf32>
    %cst_9 = arith.constant dense<0.000000e+00> : vector<32x128xf32>
    %12 = tpu.matmul %11, %10, %cst_9 {dimension_numbers = #tpu.dot_dimension_numbers<[1], [0], [0], [1], [0, 0, 1, 1], [], []>} : vector<32x64xf32>, vector<64x128xf32>, vector<32x128xf32> -> vector<32x128xf32>
    %c0_10 = arith.constant 0 : index
    %c0_11 = arith.constant 0 : index
    %13 = vector.load %arg5[%c0_10, %c0_11] : memref<32x1xf32, #tpu.memory_space<vmem>>, vector<32x1xf32>
    %14 = vector.broadcast %13 : vector<32x1xf32> to vector<32x128xf32>
    %15 = arith.addf %12, %14 : vector<32x128xf32>
    %cst_12 = arith.constant 0.000000e+00 : f32
    %16 = vector.broadcast %cst_12 : f32 to vector<32x128xf32>
    %17 = arith.cmpf ogt, %15, %16 : vector<32x128xf32>
    %cst_13 = arith.constant 2.000000e-01 : f32
    %18 = vector.broadcast %cst_13 : f32 to vector<32x128xf32>
    %19 = arith.mulf %18, %15 : vector<32x128xf32>
    %20 = arith.select %17, %15, %19 : vector<32x128xi1>, vector<32x128xf32>
    %c0_14 = arith.constant 0 : index
    %c0_15 = arith.constant 0 : index
    %21 = vector.load %arg6[%c0_14, %c0_15] : memref<16x32xf32, #tpu.memory_space<vmem>>, vector<16x32xf32>
    %cst_16 = arith.constant dense<0.000000e+00> : vector<16x128xf32>
    %22 = tpu.matmul %21, %20, %cst_16 {dimension_numbers = #tpu.dot_dimension_numbers<[1], [0], [0], [1], [0, 0, 1, 1], [], []>} : vector<16x32xf32>, vector<32x128xf32>, vector<16x128xf32> -> vector<16x128xf32>
    %c0_17 = arith.constant 0 : index
    %c0_18 = arith.constant 0 : index
    %23 = vector.load %arg7[%c0_17, %c0_18] : memref<16x1xf32, #tpu.memory_space<vmem>>, vector<16x1xf32>
    %24 = vector.broadcast %23 : vector<16x1xf32> to vector<16x128xf32>
    %25 = arith.addf %22, %24 : vector<16x128xf32>
    %cst_19 = arith.constant 0.000000e+00 : f32
    %26 = vector.broadcast %cst_19 : f32 to vector<16x128xf32>
    %27 = arith.cmpf ogt, %25, %26 : vector<16x128xf32>
    %cst_20 = arith.constant 2.000000e-01 : f32
    %28 = vector.broadcast %cst_20 : f32 to vector<16x128xf32>
    %29 = arith.mulf %28, %25 : vector<16x128xf32>
    %30 = arith.select %27, %25, %29 : vector<16x128xi1>, vector<16x128xf32>
    %31 = vector.extract_strided_slice %0 {offsets = [0, 0], sizes = [8, 128], strides = [1, 1]} : vector<16x128xf32> to vector<8x128xf32>
    %32 = vector.extract_strided_slice %0 {offsets = [8, 0], sizes = [8, 128], strides = [1, 1]} : vector<16x128xf32> to vector<8x128xf32>
    %33 = arith.mulf %31, %32 : vector<8x128xf32>
    %c0_21 = arith.constant 0 : index
    %c0_22 = arith.constant 0 : index
    %34 = vector.load %arg8[%c0_21, %c0_22] : memref<8x1xf32, #tpu.memory_space<vmem>>, vector<8x1xf32>
    %35 = vector.broadcast %34 : vector<8x1xf32> to vector<8x128xf32>
    %36 = arith.mulf %33, %35 : vector<8x128xf32>
    %cst_23 = arith.constant dense<0.000000e+00> : vector<128xf32>
    %37 = vector.multi_reduction <add>, %36, %cst_23 [0] : vector<8x128xf32> to vector<128xf32>
    %38 = vector.shape_cast %37 : vector<128xf32> to vector<1x128xf32>
    %c0_24 = arith.constant 0 : index
    %c0_25 = arith.constant 0 : index
    %39 = vector.load %arg9[%c0_24, %c0_25] : memref<16x1xf32, #tpu.memory_space<vmem>>, vector<16x1xf32>
    %40 = vector.broadcast %39 : vector<16x1xf32> to vector<16x128xf32>
    %41 = arith.mulf %30, %40 : vector<16x128xf32>
    %cst_26 = arith.constant dense<0.000000e+00> : vector<128xf32>
    %42 = vector.multi_reduction <add>, %41, %cst_26 [0] : vector<16x128xf32> to vector<128xf32>
    %43 = vector.shape_cast %42 : vector<128xf32> to vector<1x128xf32>
    %44 = arith.addf %38, %43 : vector<1x128xf32>
    %c0_27 = arith.constant 0 : index
    %c0_28 = arith.constant 0 : index
    %45 = vector.load %arg10[%c0_27, %c0_28] : memref<1x1xf32, #tpu.memory_space<vmem>>, vector<1x1xf32>
    %46 = vector.broadcast %45 : vector<1x1xf32> to vector<1x128xf32>
    %47 = arith.addf %44, %46 : vector<1x128xf32>
    %c0_29 = arith.constant 0 : index
    %c0_30 = arith.constant 0 : index
    %48 = vector.load %arg11[%c0_29, %c0_30] : memref<1x128xf32, #tpu.memory_space<vmem>>, vector<1x128xf32>
    tpu.vector_store %arg11[%c0_29, %c0_30], %47 {strides = array<i32>} : memref<1x128xf32, #tpu.memory_space<vmem>>, vector<1x128xf32>,
    return
  }
  func.func @transform_0(%arg0: i32) -> (i32, i32) {
    %c0_i32 = arith.constant 0 : i32
    %c0_i32_0 = arith.constant 0 : i32
    return %c0_i32, %arg0 : i32, i32
  }
  func.func @transform_1(%arg0: i32) -> (i32, i32) {
    %c0_i32 = arith.constant 0 : i32
    %c0_i32_0 = arith.constant 0 : i32
    %c0_i32_1 = arith.constant 0 : i32
    return %c0_i32, %c0_i32_0 : i32, i32
  }
  func.func @transform_2(%arg0: i32) -> (i32, i32) {
    %c0_i32 = arith.constant 0 : i32
    %c0_i32_0 = arith.constant 0 : i32
    %c0_i32_1 = arith.constant 0 : i32
    return %c0_i32, %c0_i32_0 : i32, i32
  }
  func.func @transform_3(%arg0: i32) -> (i32, i32) {
    %c0_i32 = arith.constant 0 : i32
    %c0_i32_0 = arith.constant 0 : i32
    %c0_i32_1 = arith.constant 0 : i32
    return %c0_i32, %c0_i32_0 : i32, i32
  }
  func.func @transform_4(%arg0: i32) -> (i32, i32) {
    %c0_i32 = arith.constant 0 : i32
    %c0_i32_0 = arith.constant 0 : i32
    %c0_i32_1 = arith.constant 0 : i32
    return %c0_i32, %c0_i32_0 : i32, i32
  }
  func.func @transform_5(%arg0: i32) -> (i32, i32) {
    %c0_i32 = arith.constant 0 : i32
    %c0_i32_0 = arith.constant 0 : i32
    %c0_i32_1 = arith.constant 0 : i32
    return %c0_i32, %c0_i32_0 : i32, i32
  }
  func.func @transform_6(%arg0: i32) -> (i32, i32) {
    %c0_i32 = arith.constant 0 : i32
    %c0_i32_0 = arith.constant 0 : i32
    %c0_i32_1 = arith.constant 0 : i32
    return %c0_i32, %c0_i32_0 : i32, i32
  }
  func.func @transform_7(%arg0: i32) -> (i32, i32) {
    %c0_i32 = arith.constant 0 : i32
    %c0_i32_0 = arith.constant 0 : i32
    %c0_i32_1 = arith.constant 0 : i32
    return %c0_i32, %c0_i32_0 : i32, i32
  }
  func.func @transform_8(%arg0: i32) -> (i32, i32) {
    %c0_i32 = arith.constant 0 : i32
    %c0_i32_0 = arith.constant 0 : i32
    %c0_i32_1 = arith.constant 0 : i32
    return %c0_i32, %c0_i32_0 : i32, i32
  }
  func.func @transform_9(%arg0: i32) -> (i32, i32) {
    %c0_i32 = arith.constant 0 : i32
    %c0_i32_0 = arith.constant 0 : i32
    %c0_i32_1 = arith.constant 0 : i32
    return %c0_i32, %c0_i32_0 : i32, i32
  }
  func.func @transform_10(%arg0: i32) -> (i32, i32) {
    %c0_i32 = arith.constant 0 : i32
    %c0_i32_0 = arith.constant 0 : i32
    return %c0_i32, %arg0 : i32, i32
  }
}

</mosaic_0001>

<bundles_post_ra>
// kernel: ncf_forward.1
= control target key start
LH: loop header
LB: loop body
LE: loop exit
PB: predicated region body
PF: predicated region fallthrough
CT: control target
= control target key end

     0   :  { %v394_v0 = vmov 0   ;;  %vm95_vm0 = vcmask 130048   ;;  %vm213_vm9 = vcmask 523264   ;;  %vm281_vm14 = vcmask 261120   ;;  %s573_s2 = inlined_call_operand.vmem [shape: f32[64,1], index: 2, kind: input, shape index: {}]   ;;  %s574_s0 = inlined_call_operand.vmem [shape: f32[16,128], index: 0, kind: input, shape index: {}]   ;;  %s575_s1 = inlined_call_operand.vmem [shape: f32[64,16], index: 1, kind: input, shape index: {}]   ;;  %s576_s9 = inlined_call_operand.<no memory space> [shape: f32[1,1], index: 9, kind: input, shape index: {}]   ;;  %s577_s4 = inlined_call_operand.vmem [shape: f32[32,1], index: 4, kind: input, shape index: {}]   ;;  %s578_s6 = inlined_call_operand.vmem [shape: f32[16,1], index: 6, kind: input, shape index: {}]   ;;  %s579_s8 = inlined_call_operand.vmem [shape: f32[16,1], index: 8, kind: input, shape index: {}]   ;;  %s580_s7 = inlined_call_operand.vmem [shape: f32[8,1], index: 7, kind: input, shape index: {}]   ;;  %s581_s3 = inlined_call_operand.vmem [shape: f32[32,64], index: 3, kind: input, shape index: {}]   ;;  %s582_s5 = inlined_call_operand.vmem [shape: f32[16,32], index: 5, kind: input, shape index: {}]   ;;  %s583_s10 = inlined_call_operand.vmem [shape: f32[1,128], index: 10, kind: output, shape index: {}]  }
   0x1   :  { %392 = vset.pattern.permute.xlu1 %v394_v0  ;;  %391 = vset.pattern.permute.xlu0 %v394_v0  ;;  %v54_v1 = vld [vmem:[%s573_s2 + $0x38] sm:$0xff]  ;;  %v52_v2 = vld [vmem:[%s573_s2 + $0x28] sm:$0xff]  ;;  %v464_v4 = vld [vmem:[%s574_s0] sm:$0xff]  ;;  %v15_v10 = vstv %s576_s9 }
   0x2   :  { %v459_v3 = vld [vmem:[%s574_s0 + $0x8] sm:$0xff]  ;;  %92 = vperm.xlu0 %391, %v54_v1   ;;  %82 = vperm.xlu1 %392, %v52_v2   ;;  %v43_v5 = vld [vmem:[%s575_s1 + $0x20] sm:$0xff]  ;;  %v50_v7 = vld [vmem:[%s573_s2 + $0x18] sm:$0xff]  ;;  %16 = vst [vmem:[#allocation2] sm:$0x1] %v15_v10 }
   0x3   :  { %380 = vmatpush.msra.mxu3 %v459_v3  ;;  %134 = vmatpush.msra.mxu0 %v459_v3  ;;  %v39_v6 = vld [vmem:[%s575_s1] sm:$0xff]  ;;  %v53_v8 = vld [vmem:[%s573_s2 + $0x30] sm:$0xff]  ;;  %v44_v11 = vld [vmem:[%s575_s1 + $0x28] sm:$0xff] }
   0x4   :  { %393 = vset.pattern.permute.xlu2 %v394_v0  ;;  %v51_v9 = vld [vmem:[%s573_s2 + $0x20] sm:$0xff]  ;;  %v40_v12 = vld [vmem:[%s575_s1 + $0x8] sm:$0xff]  ;;  %v49_v13 = vld [vmem:[%s573_s2 + $0x10] sm:$0xff] }
   0x5   :  { %381 = vmatpush.msra.mxu3 %v464_v4  ;;  %135 = vmatpush.msra.mxu0 %v464_v4  ;;  %v48_v14 = vld [vmem:[%s573_s2 + $0x8] sm:$0xff]  ;;  %v47_v15 = vld [vmem:[%s573_s2] sm:$0xff]  ;;  %v45_v16 = vld [vmem:[%s575_s1 + $0x30] sm:$0xff] }
   0x6   :  { %370 = vmatmul.msk.f32.vlgmr.msra.gmra.mxu3 %vm95_vm0, %v43_v5  ;;  %366 = vmatmul.msk.f32.vlgmr.msra.gmra.mxu0 %vm95_vm0, %v39_v6  ;;  %v41_v17 = vld [vmem:[%s575_s1 + $0x10] sm:$0xff]  ;;  %v192_v18 = vld [vmem:[%s577_s4 + $0x18] sm:$0xff]  ;;  %v190_v20 = vld [vmem:[%s577_s4 + $0x8] sm:$0xff] }
   0x7   :  { %72 = vperm.xlu2 %393, %v50_v7   ;;  %v191_v19 = vld [vmem:[%s577_s4 + $0x10] sm:$0xff]  ;;  %v46_v21 = vld [vmem:[%s575_s1 + $0x38] sm:$0xff]  ;;  %v189_v23 = vld [vmem:[%s577_s4] sm:$0xff] }
   0x8   :  { %v42_v22 = vld [vmem:[%s575_s1 + $0x18] sm:$0xff]  ;;  %v269_v24 = vld [vmem:[%s578_s6] sm:$0xff]  ;;  %v270_v25 = vld [vmem:[%s578_s6 + $0x8] sm:$0xff] }
   0x9   :  { %v331_v26 = vld [vmem:[%s579_s8] sm:$0xff]  ;;  %v332_v27 = vld [vmem:[%s579_s8 + $0x8] sm:$0xff] }
   0xa   :  { %87 = vperm.xlu0 %391, %v53_v8   ;;  %77 = vperm.xlu1 %392, %v51_v9   ;;  %v318_v28 = vld [vmem:[%s580_s7] sm:$0xff]  ;;  %v188_v8 = vld [vmem:[%s581_s3 + $0x18] sm:$0xff]  ;;  %v186_v10 = vld [vmem:[%s581_s3 + $0x8] sm:$0xff] }
   0xb   :  { %v353_v29 = vld [vmem:[#allocation2] sm:$0x1] }
   0xc   :  { %v185_v7 = vld [vmem:[%s581_s3] sm:$0xff] }
   0xe   :  { %371 = vmatmul.msk.f32.gmra.mxu3 %vm95_vm0, %v44_v11  ;;  %367 = vmatmul.msk.f32.gmra.mxu0 %vm95_vm0, %v40_v12  ;;  %v187_v11 = vld [vmem:[%s581_s3 + $0x10] sm:$0xff] }
   0xf   :  { %67 = vperm.xlu2 %393, %v49_v13  }
  0x12   :  { %62 = vperm.xlu0 %391, %v48_v14   ;;  %57 = vperm.xlu1 %392, %v47_v15  }
  0x16   :  { %372 = vmatmul.msk.f32.gmra.mxu3 %vm95_vm0, %v45_v16  ;;  %368 = vmatmul.msk.f32.gmra.mxu0 %vm95_vm0, %v41_v17 }
  0x17   :  { %210 = vperm.xlu2 %393, %v192_v18  }
  0x1a   :  { %205 = vperm.xlu0 %391, %v191_v19   ;;  %200 = vperm.xlu1 %392, %v190_v20  }
  0x1e   :  { %373 = vmatmul.msk.f32.gmra.mxu3 %vm95_vm0, %v46_v21  ;;  %369 = vmatmul.msk.f32.gmra.mxu0 %vm95_vm0, %v42_v22 }
  0x1f   :  { %195 = vperm.xlu2 %393, %v189_v23  }
  0x22   :  { %273 = vperm.xlu0 %391, %v269_v24   ;;  %278 = vperm.xlu1 %392, %v270_v25  }
  0x27   :  { %335 = vperm.xlu2 %393, %v331_v26  }
  0x2a   :  { %340 = vperm.xlu0 %391, %v332_v27   ;;  %321 = vperm.xlu1 %392, %v318_v28  }
  0x2f   :  { %356 = vperm.xlu2 %393, %v353_v29  }
  0x61   :  { %v73_v38 = vpop.permute.xlu2 %72 }
  0x69   :  { %v68_v52 = vpop.permute.xlu2 %67 }
  0x71   :  { %v211_v13 = vpop.permute.xlu2 %210 }
  0x74   :  { %v93_v34 = vpop.permute.xlu0 %92  ;;  %v83_v35 = vpop.permute.xlu1 %82 }
  0x79   :  { %v196_v20 = vpop.permute.xlu2 %195 }
  0x7c   :  { %v88_v39 = vpop.permute.xlu0 %87  ;;  %v78_v41 = vpop.permute.xlu1 %77 }
  0x83   :  { %v137_v30 = vpop.f32.mrf.mxu0 }
  0x84   :  { %v63_v56 = vpop.permute.xlu0 %62  ;;  %v58_v60 = vpop.permute.xlu1 %57 }
  0x85   :  { %v138_v61 = vadd.f32 %v137_v30, %v58_v60 }
  0x87   :  { %v169_v5 = vmul.f32 0.2, %v138_v61  ;;  %vm161_vm8 = vcmp.gt.f32.partialorder %v138_v61, 0.0 }
  0x89   :  { %v149_v31 = vpop.f32.mrf.mxu3  ;;  %v177_v9 = vsel %vm161_vm8, %v138_v61, %v169_v5 }
  0x8a   :  { %v150_v46 = vadd.f32 %v149_v31, %v78_v41  ;;  %v267_v31 = vld [vmem:[%s582_s5] sm:$0xff] }
  0x8b   :  { %v140_v32 = vpop.f32.mrf.mxu0 }
  0x8c   :  { %v173_v55 = vmul.f32 0.2, %v150_v46  ;;  %vm165_vm4 = vcmp.gt.f32.partialorder %v150_v46, 0.0  ;;  %v141_v57 = vadd.f32 %v140_v32, %v63_v56  ;;  %v201_v19 = vpop.permute.xlu1 %200  ;;  %v206_v22 = vpop.permute.xlu0 %205 }
  0x8e   :  { %v181_v62 = vsel %vm165_vm4, %v150_v46, %v173_v55  ;;  %v170_v1 = vmul.f32 0.2, %v141_v57  ;;  %vm162_vm7 = vcmp.gt.f32.partialorder %v141_v57, 0.0 }
  0x90   :  { %v178_v6 = vsel %vm162_vm7, %v141_v57, %v170_v1 }
  0x91   :  { %v152_v33 = vpop.f32.mrf.mxu3 }
  0x92   :  { %v153_v43 = vadd.f32 %v152_v33, %v83_v35  ;;  %v268_v33 = vld [vmem:[%s582_s5 + $0x8] sm:$0xff]  ;;  %v317_v35 = vmul.f32 %v459_v3, %v464_v4 }
  0x93   :  { %v143_v36 = vpop.f32.mrf.mxu0 }
  0x94   :  { %v174_v51 = vmul.f32 0.2, %v153_v43  ;;  %vm166_vm3 = vcmp.gt.f32.partialorder %v153_v43, 0.0  ;;  %v144_v53 = vadd.f32 %v143_v36, %v68_v52 }
  0x96   :  { %v182_v58 = vsel %vm166_vm3, %v153_v43, %v174_v51  ;;  %v171_v63 = vmul.f32 0.2, %v144_v53  ;;  %vm163_vm6 = vcmp.gt.f32.partialorder %v144_v53, 0.0 }
  0x98   :  { %v179_v2 = vsel %vm163_vm6, %v144_v53, %v171_v63 }
  0x99   :  { %v155_v37 = vpop.f32.mrf.mxu3 }
  0x9a   :  { %v156_v40 = vadd.f32 %v155_v37, %v88_v39 }
  0x9b   :  { %v146_v45 = vpop.f32.mrf.mxu0 }
  0x9c   :  { %v175_v48 = vmul.f32 0.2, %v156_v40  ;;  %vm167_vm2 = vcmp.gt.f32.partialorder %v156_v40, 0.0  ;;  %v147_v49 = vadd.f32 %v146_v45, %v73_v38  ;;  %v274_v38 = vpop.permute.xlu0 %273 }
  0x9e   :  { %v183_v54 = vsel %vm167_vm2, %v156_v40, %v175_v48  ;;  %v172_v59 = vmul.f32 0.2, %v147_v49  ;;  %vm164_vm5 = vcmp.gt.f32.partialorder %v147_v49, 0.0  ;;  %v336_v48 = vpop.permute.xlu2 %335 }
  0xa0   :  { %v180_v0 = vsel %vm164_vm5, %v147_v49, %v172_v59 }
  0xa1   :  { %v158_v42 = vpop.f32.mrf.mxu3 }
  0xa2   :  { %v159_v44 = vadd.f32 %v158_v42, %v93_v34  ;;  %v279_v34 = vpop.permute.xlu1 %278 }
  0xa4   :  { %vm168_vm1 = vcmp.gt.f32.partialorder %v159_v44, 0.0  ;;  %v176_v47 = vmul.f32 0.2, %v159_v44  ;;  %v341_v49 = vpop.permute.xlu0 %340 }
  0xa6   :  { %v184_v50 = vsel %vm168_vm1, %v159_v44, %v176_v47  ;;  %v357_v60 = vpop.permute.xlu2 %356 }
  0xa7   :  { %234 = vmatpush.msra.mxu1 %v184_v50  ;;  %382 = vmatpush.msra.mxu2 %v184_v50  ;;  %v359_v63 = vperm.slane %v357_v60, 0 }
  0xa9   :  { %235 = vmatpush.msra.mxu1 %v183_v54  ;;  %383 = vmatpush.msra.mxu2 %v183_v54 }
  0xaa   :  { %v322_v37 = vpop.permute.xlu1 %321 }
  0xab   :  { %236 = vmatpush.msra.mxu1 %v182_v58  ;;  %384 = vmatpush.msra.mxu2 %v182_v58  ;;  %v324_v40 = vmul.f32 %v322_v37, %v317_v35 }
  0xad   :  { %237 = vmatpush.msra.mxu1 %v181_v62  ;;  %385 = vmatpush.msra.mxu2 %v181_v62  ;;  %v325_v42 = vrot.slane %v324_v40, 4 }
  0xaf   :  { %238 = vmatpush.msra.mxu1 %v180_v0  ;;  %386 = vmatpush.msra.mxu2 %v180_v0  ;;  %v326_v47 = vadd.f32 %v325_v42, %v324_v40 }
  0xb1   :  { %239 = vmatpush.msra.mxu1 %v179_v2  ;;  %387 = vmatpush.msra.mxu2 %v179_v2  ;;  %v327_v3 = vrot.slane %v326_v47, 2 }
  0xb3   :  { %240 = vmatpush.msra.mxu1 %v178_v6  ;;  %388 = vmatpush.msra.mxu2 %v178_v6  ;;  %v328_v54 = vadd.f32 %v327_v3, %v326_v47 }
  0xb5   :  { %241 = vmatpush.msra.mxu1 %v177_v9  ;;  %389 = vmatpush.msra.mxu2 %v177_v9  ;;  %v329_v57 = vrot.slane %v328_v54, 1 }
  0xb6   :  { %374 = vmatmul.msk.f32.vlgmr.msra.gmra.mxu1 %vm213_vm9, %v185_v7  ;;  %377 = vmatmul.msk.f32.vlgmr.msra.gmra.mxu2 %vm213_vm9, %v188_v8 }
  0xb7   :  { %v330_v61 = vadd.f32 %v329_v57, %v328_v54 }
  0xbe   :  { %375 = vmatmul.msk.f32.gmra.mxu1 %vm213_vm9, %v186_v10 }
  0xc6   :  { %376 = vmatmul.msk.f32.gmra.mxu1 %vm213_vm9, %v187_v11 }
 0x133   :  { %v243_v12 = vpop.f32.mrf.mxu1 }
 0x134   :  { %v244_v24 = vadd.f32 %v243_v12, %v196_v20 }
 0x136   :  { %v259_v29 = vmul.f32 0.2, %v244_v24  ;;  %vm255_vm13 = vcmp.gt.f32.partialorder %v244_v24, 0.0 }
 0x138   :  { %v263_v32 = vsel %vm255_vm13, %v244_v24, %v259_v29 }
 0x139   :  { %v252_v14 = vpop.f32.mrf.mxu2 }
 0x13a   :  { %v253_v15 = vadd.f32 %v252_v14, %v211_v13 }
 0x13b   :  { %v246_v16 = vpop.f32.mrf.mxu1 }
 0x13c   :  { %vm258_vm10 = vcmp.gt.f32.partialorder %v253_v15, 0.0  ;;  %v262_v17 = vmul.f32 0.2, %v253_v15  ;;  %v247_v21 = vadd.f32 %v246_v16, %v201_v19 }
 0x13e   :  { %v266_v18 = vsel %vm258_vm10, %v253_v15, %v262_v17  ;;  %v260_v27 = vmul.f32 0.2, %v247_v21  ;;  %vm256_vm12 = vcmp.gt.f32.partialorder %v247_v21, 0.0 }
 0x13f   :  { %300 = vmatpush.msrb.mxu2 %v266_v18 }
 0x140   :  { %v264_v30 = vsel %vm256_vm12, %v247_v21, %v260_v27 }
 0x143   :  { %v249_v23 = vpop.f32.mrf.mxu1 }
 0x144   :  { %v250_v25 = vadd.f32 %v249_v23, %v206_v22 }
 0x146   :  { %vm257_vm11 = vcmp.gt.f32.partialorder %v250_v25, 0.0  ;;  %v261_v26 = vmul.f32 0.2, %v250_v25 }
 0x148   :  { %v265_v28 = vsel %vm257_vm11, %v250_v25, %v261_v26 }
 0x149   :  { %301 = vmatpush.msrb.mxu2 %v265_v28 }
 0x14b   :  { %302 = vmatpush.msrb.mxu2 %v264_v30 }
 0x14d   :  { %303 = vmatpush.msrb.mxu2 %v263_v32 }
 0x14e   :  { %378 = vmatmul.msk.f32.vlgmr.msrb.gmra.mxu2 %vm281_vm14, %v267_v31 }
 0x156   :  { %379 = vmatmul.msk.f32.gmra.mxu2 %vm281_vm14, %v268_v33 }
 0x1d1   :  { %v305_v36 = vpop.f32.mrf.mxu2 }
 0x1d2   :  { %v306_v39 = vadd.f32 %v305_v36, %v274_v38 }
 0x1d4   :  { %v313_v41 = vmul.f32 0.2, %v306_v39  ;;  %vm311_vm15 = vcmp.gt.f32.partialorder %v306_v39, 0.0 }
 0x1d6   :  { %v315_v45 = vsel %vm311_vm15, %v306_v39, %v313_v41 }
 0x1d7   :  { %v343_v51 = vmul.f32 %v336_v48, %v315_v45 }
 0x1d9   :  { %v308_v43 = vpop.f32.mrf.mxu2 }
 0x1da   :  { %v309_v44 = vadd.f32 %v308_v43, %v279_v34 }
 0x1dc   :  { %vm312_vm0 = vcmp.gt.f32.partialorder %v309_v44, 0.0  ;;  %v314_v46 = vmul.f32 0.2, %v309_v44 }
 0x1de   :  { %v316_v50 = vsel %vm312_vm0, %v309_v44, %v314_v46 }
 0x1df   :  { %v344_v52 = vmul.f32 %v341_v49, %v316_v50 }
 0x1e1   :  { %v345_v4 = vadd.f32 %v344_v52, %v343_v51 }
 0x1e3   :  { %v346_v53 = vrot.slane %v345_v4, 4 }
 0x1e5   :  { %v347_v55 = vadd.f32 %v346_v53, %v345_v4 }
 0x1e7   :  { %v348_v56 = vrot.slane %v347_v55, 2 }
 0x1e9   :  { %v349_v58 = vadd.f32 %v348_v56, %v347_v55 }
 0x1eb   :  { %v350_v59 = vrot.slane %v349_v58, 1 }
 0x1ed   :  { %v351_v62 = vadd.f32 %v350_v59, %v349_v58 }
 0x1ef   :  { %v352_v0 = vadd.f32 %v351_v62, %v330_v61 }
 0x1f1   :  { %v360_v1 = vadd.f32 %v359_v63, %v352_v0 }
 0x1f3   :  { %361 = vst [vmem:[%s583_s10] sm:$0x1] %v360_v1 }

</bundles_post_ra>
